<compile_context>
chip_gen: v5e
topology: v5e:2x2
jax: 0.10.0
libtpu: 0.0.40
codegen_flags: <defaults>
</compile_context>

<pallas_src>
import functools

import jax
import jax.numpy as jnp
from jax.experimental import pallas as pl
from jax.experimental.pallas import tpu as pltpu

_LN_EPS = 1e-5                      # torch.nn.LayerNorm default


# --------------------------------------------------------------------------
# Hardware / tiling helpers
# --------------------------------------------------------------------------
def _sublane(dtype):
    # sublane packing: 8 rows for 4-byte, 16 for 2-byte, 32 for 1-byte dtypes
    return {4: 8, 2: 16, 1: 32}.get(jnp.dtype(dtype).itemsize, 8)


def _round_up(v, m):
    return ((v + m - 1) // m) * m


def _align_down(v, m):
    return max(m, (v // m) * m)


def _vmem_info():
    """Returns (physical VMEM bytes per core, scoped limit to request).

    ~80% of physical VMEM: v5e/v6e (128 MiB) -> ~102 MiB (above the 64 MiB
    that previously capped tiling), v7x (64 MiB) -> ~51 MiB (headroom for
    Mosaic internal scratch).  Falls back to a conservative 64 MiB if the
    query is unavailable."""
    cap = 64 * 1024 * 1024
    try:
        cap = int(getattr(pltpu.get_tpu_info(), "vmem_capacity_bytes", cap))
    except Exception:
        pass
    limit = max(32 * 1024 * 1024, int(0.80 * cap))
    return cap, limit


def _pick_rows(n_rows, dtype, bytes_per_row, budget, target_rows):
    """Largest sublane-aligned row tile <= target_rows whose per-tile working
    set (bytes_per_row * tm) fits inside `budget`."""
    tm = min(n_rows, target_rows, max(1, budget // max(1, bytes_per_row)))
    if tm >= n_rows:
        return n_rows
    return _align_down(tm, _sublane(dtype))


def _rows_for_bytes(d, itemsize, target_bytes=4 << 20):
    # memory-bound kernels: ~2-8 MiB per stream tile reaches ~85% of the HBM
    # roofline; size the row tile for ~4 MiB per buffer instead of a fixed 512.
    return max(8, target_bytes // max(1, d * itemsize))


# --------------------------------------------------------------------------
# Kernel 1: LayerNorm over the last dim (two-pass variance)
# --------------------------------------------------------------------------
def _layernorm_kernel(x_ref, g_ref, b_ref, o_ref):
    x = x_ref[...].astype(jnp.float32)                         # (TM, D)
    mean = jnp.mean(x, axis=-1, keepdims=True)
    xc = x - mean                                              # two-pass: no
    var = jnp.mean(xc * xc, axis=-1, keepdims=True)            # E[x^2]-E[x]^2
    inv = jax.lax.rsqrt(var + _LN_EPS)                         # cancellation
    y = xc * inv * g_ref[...].astype(jnp.float32) \
        + b_ref[...].astype(jnp.float32)
    o_ref[...] = y.astype(o_ref.dtype)


def layernorm(x2d, gamma, beta, *, tile_rows=None):
    """x2d: (N, D); gamma/beta: (D,). LayerNorm over D."""
    N, D = x2d.shape
    _, limit = _vmem_info()
    isz = jnp.dtype(x2d.dtype).itemsize
    # x double-buffer + out double-buffer + ~2 f32 temporaries (x, xc)
    bytes_per_row = D * (4 * isz + 8)
    tm = tile_rows or _pick_rows(N, x2d.dtype, bytes_per_row,
                                 int(0.75 * limit), _rows_for_bytes(D, isz))
    return pl.pallas_call(
        _layernorm_kernel,
        out_shape=jax.ShapeDtypeStruct((N, D), x2d.dtype),
        grid_spec=pltpu.PrefetchScalarGridSpec(
            num_scalar_prefetch=0,
            grid=(pl.cdiv(N, tm),),
            in_specs=[
                pl.BlockSpec((tm, D), lambda i: (i, 0)),
                pl.BlockSpec((1, D), lambda i: (0, 0)),
                pl.BlockSpec((1, D), lambda i: (0, 0)),
            ],
            out_specs=pl.BlockSpec((tm, D), lambda i: (i, 0)),
        ),
        compiler_params=pltpu.CompilerParams(
            dimension_semantics=("parallel",),
            vmem_limit_bytes=limit),
    )(x2d, gamma.reshape(1, D), beta.reshape(1, D))


# --------------------------------------------------------------------------
# Kernel 2: residual add (dropout in eval mode == identity)
# --------------------------------------------------------------------------
def _residual_add_kernel(sub_ref, x_ref, o_ref):
    o_ref[...] = sub_ref[...] + x_ref[...]


def residual_add(sub_x2d, x2d, *, tile_rows=None, alias_x=False):
    """out = sub_x2d + x2d.

    alias_x=True aliases x2d's buffer to the output (3 HBM streams -> 2,
    ~33% faster on this memory-bound kernel) but is ONLY safe if x2d is dead
    afterwards and properly donated under jit."""
    N, D = x2d.shape
    _, limit = _vmem_info()
    isz = jnp.dtype(x2d.dtype).itemsize
    bytes_per_row = D * 6 * isz          # 2 inputs + 1 output, double-buffered
    tm = tile_rows or _pick_rows(N, x2d.dtype, bytes_per_row,
                                 int(0.75 * limit), _rows_for_bytes(D, isz))
    extra = {"input_output_aliases": {1: 0}} if alias_x else {}
    return pl.pallas_call(
        _residual_add_kernel,
        out_shape=jax.ShapeDtypeStruct((N, D), x2d.dtype),
        grid_spec=pltpu.PrefetchScalarGridSpec(
            num_scalar_prefetch=0,
            grid=(pl.cdiv(N, tm),),
            in_specs=[
                pl.BlockSpec((tm, D), lambda i: (i, 0)),
                pl.BlockSpec((tm, D), lambda i: (i, 0)),
            ],
            out_specs=pl.BlockSpec((tm, D), lambda i: (i, 0)),
        ),
        compiler_params=pltpu.CompilerParams(
            dimension_semantics=("parallel",),
            vmem_limit_bytes=limit),
        **extra,
    )(sub_x2d, x2d)


# --------------------------------------------------------------------------
# Kernel 3a: fused LN -> (xn @ W + b) -> residual, W fully VMEM-resident
# --------------------------------------------------------------------------
def _fused_resident_kernel(x_ref, g_ref, b_ref, w_ref, bias_ref, o_ref, *,
                           d_real, d_pad):
    x = x_ref[...].astype(jnp.float32)                         # (TM, Dp)
    mean = jnp.sum(x, axis=-1, keepdims=True) * (1.0 / d_real)
    xc = x - mean
    if d_pad > d_real:
        # padded lanes hold zeros; mask them so the two-pass variance is exact
        lane = jax.lax.broadcasted_iota(jnp.int32, xc.shape, 1)
        xc = jnp.where(lane < d_real, xc, 0.0)
    var = jnp.sum(xc * xc, axis=-1, keepdims=True) * (1.0 / d_real)
    inv = jax.lax.rsqrt(var + _LN_EPS)
    xn = xc * inv * g_ref[...].astype(jnp.float32) \
         + b_ref[...].astype(jnp.float32)
    # MXU matmul with f32 accumulation; bias + residual fused in the epilogue.
    y = jnp.dot(xn.astype(w_ref.dtype), w_ref[...],
                preferred_element_type=jnp.float32)
    o_ref[...] = (y + bias_ref[...].astype(jnp.float32) + x).astype(o_ref.dtype)


# --------------------------------------------------------------------------
# Kernel 3b: fused path when W must stay column-tiled (large D)
# --------------------------------------------------------------------------
def _fused_tiled_kernel(x_ref, g_ref, b_ref, w_ref, bias_ref, o_ref, xn_ref, *,
                        d_real, d_pad, tn):
    j = pl.program_id(1)

    # LayerNorm of this row tile computed once (at column tile 0) into VMEM
    # scratch, reused for every output-column tile of the same rows.
    @pl.when(j == 0)
    def _():
        x = x_ref[...].astype(jnp.float32)                     # (TM, Dp)
        mean = jnp.sum(x, axis=-1, keepdims=True) * (1.0 / d_real)
        xc = x - mean
        if d_pad > d_real:
            lane = jax.lax.broadcasted_iota(jnp.int32, xc.shape, 1)
            xc = jnp.where(lane < d_real, xc, 0.0)
        var = jnp.sum(xc * xc, axis=-1, keepdims=True) * (1.0 / d_real)
        inv = jax.lax.rsqrt(var + _LN_EPS)
        xn = xc * inv * g_ref[...].astype(jnp.float32) \
             + b_ref[...].astype(jnp.float32)
        xn_ref[...] = xn.astype(xn_ref.dtype)

    y = jnp.dot(xn_ref[...], w_ref[...], preferred_element_type=jnp.float32)
    # Residual + bias sliced out of the already-resident full-width blocks:
    # no duplicate N*D HBM read of x, no per-(i,j) bias DMA.
    start = pl.multiple_of(j * tn, tn)                 # tn is a multiple of 128
    x_res = x_ref[:, pl.ds(start, tn)].astype(jnp.float32)
    bias = bias_ref[:, pl.ds(start, tn)].astype(jnp.float32)
    o_ref[...] = (y + bias + x_res).astype(o_ref.dtype)


def fused_linear_sublayer_forward(x, ln_gamma, ln_beta, W, bias,
                                  *, tile_rows=None, tile_cols=None):
    """Sublayer.forward where the wrapped sublayer is  xn -> xn @ W + bias.

    Returns (dropout(xn @ W + bias) + x, None)  with eval-mode dropout.
    """
    B, S, D = x.shape
    assert W.shape == (D, D), "residual connection requires a (D, D) projection"
    N = B * S
    dt = x.dtype
    isz = jnp.dtype(dt).itemsize

    # Pad d_model to a multiple of 128 -> lane-dense (unmasked) stores.
    # Zero padding of gamma/beta/W/bias keeps every padded lane exactly zero.
    D_pad = _round_up(D, 128)
    pad = D_pad - D
    x2d = x.reshape(N, D)
    if pad:
        x2dp = jnp.pad(x2d, ((0, 0), (0, pad)))
        Wp = jnp.pad(W, ((0, pad), (0, pad)))
        g = jnp.pad(ln_gamma.reshape(1, D), ((0, 0), (0, pad)))
        bt = jnp.pad(ln_beta.reshape(1, D), ((0, 0), (0, pad)))
        bi = jnp.pad(bias.reshape(1, D), ((0, 0), (0, pad)))
    else:
        x2dp, Wp = x2d, W
        g = ln_gamma.reshape(1, D)
        bt = ln_beta.reshape(1, D)
        bi = bias.reshape(1, D)

    cap, limit = _vmem_info()
    budget = int(0.75 * limit)
    big_vmem = cap >= 96 * 1024 * 1024            # v5e/v6e (128 MiB) vs v7x (64)
    target = 1024 if big_vmem else 512            # MXU-bound row-tile targets
    sub = _sublane(dt)

    w_dbuf = 2 * D_pad * D_pad * jnp.dtype(Wp.dtype).itemsize

    if w_dbuf <= int(0.4 * budget):
        # ---- Path A: W fully VMEM-resident (constant index map => one DMA),
        #      rows-only grid, LN in registers, full-width lane-dense output.
        # per-row VMEM: x dbuf + out dbuf + ~3 f32 temporaries (x, xc, acc)
        bytes_per_row = D_pad * (4 * isz + 12)
        tm = tile_rows or _pick_rows(N, dt, bytes_per_row,
                                     max(1, budget - w_dbuf), target)
        if (not big_vmem) and N >= 2 * sub:
            # keep >= 2 row blocks so both v7x TensorCores get work
            tm = min(tm, _align_down(-(-N // 2), sub))
        out2dp = pl.pallas_call(
            functools.partial(_fused_resident_kernel, d_real=D, d_pad=D_pad),
            out_shape=jax.ShapeDtypeStruct((N, D_pad), dt),
            grid_spec=pltpu.PrefetchScalarGridSpec(
                num_scalar_prefetch=0,
                grid=(pl.cdiv(N, tm),),
                in_specs=[
                    pl.BlockSpec((tm, D_pad), lambda i: (i, 0)),      # x
                    pl.BlockSpec((1, D_pad), lambda i: (0, 0)),       # gamma
                    pl.BlockSpec((1, D_pad), lambda i: (0, 0)),       # beta
                    pl.BlockSpec((D_pad, D_pad), lambda i: (0, 0)),   # W (resident)
                    pl.BlockSpec((1, D_pad), lambda i: (0, 0)),       # bias
                ],
                out_specs=pl.BlockSpec((tm, D_pad), lambda i: (i, 0)),
            ),
            compiler_params=pltpu.CompilerParams(
                dimension_semantics=("parallel",),
                vmem_limit_bytes=limit),
        )(x2dp, g, bt, Wp, bi)
    else:
        # ---- Path B: W column-tiled; large row tile so the kernel stays
        #      MXU-bound despite re-streaming W once per row tile.
        tn = tile_cols or (256 if D_pad % 256 == 0 else 128)
        w_tile = 2 * D_pad * tn * jnp.dtype(Wp.dtype).itemsize
        # x dbuf + xn scratch + ~2 f32 LN temps + out dbuf
        bytes_per_row = D_pad * (3 * isz + 8) + tn * 2 * isz
        tm = tile_rows or _pick_rows(N, dt, bytes_per_row,
                                     max(1, budget - w_tile), target)
        if (not big_vmem) and N >= 2 * sub:
            tm = min(tm, _align_down(-(-N // 2), sub))
        out2dp = pl.pallas_call(
            functools.partial(_fused_tiled_kernel, d_real=D, d_pad=D_pad, tn=tn),
            out_shape=jax.ShapeDtypeStruct((N, D_pad), dt),
            grid_spec=pltpu.PrefetchScalarGridSpec(
                num_scalar_prefetch=0,
                grid=(pl.cdiv(N, tm), D_pad // tn),
                in_specs=[
                    # full-width row block: constant column index across j, so
                    # it is DMA'd once per row tile and supplies the residual
                    pl.BlockSpec((tm, D_pad), lambda i, j: (i, 0)),
                    pl.BlockSpec((1, D_pad), lambda i, j: (0, 0)),    # gamma
                    pl.BlockSpec((1, D_pad), lambda i, j: (0, 0)),    # beta
                    pl.BlockSpec((D_pad, tn), lambda i, j: (0, j)),   # W tile
                    pl.BlockSpec((1, D_pad), lambda i, j: (0, 0)),    # bias (full)
                ],
                out_specs=pl.BlockSpec((tm, tn), lambda i, j: (i, j)),
                scratch_shapes=[pltpu.VMEM((tm, D_pad), dt)],         # xn rows
            ),
            compiler_params=pltpu.CompilerParams(
                dimension_semantics=("parallel", "arbitrary"),
                vmem_limit_bytes=limit),
        )(x2dp, g, bt, Wp, bi)

    out2d = out2dp[:, :D] if pad else out2dp
    return out2d.reshape(B, S, D), None


# --------------------------------------------------------------------------
# Generic Sublayer forward (arbitrary user sublayer_fn, eval-mode dropout)
# --------------------------------------------------------------------------
def sublayer_forward(x, ln_gamma, ln_beta, sublayer_fn, *, alias_residual=False):
    """Mirrors Sublayer.forward (eval mode).

    x: (B, S, D); sublayer_fn: callable xn -> (sublayer_x, state).
    alias_residual=True saves one HBM stream in the residual add but requires
    that x is dead afterwards (and donated under jit)."""
    B, S, D = x.shape
    x2d = x.reshape(B * S, D)

    xn = layernorm(x2d, ln_gamma, ln_beta).reshape(B, S, D)
    sublayer_x, state = sublayer_fn(xn)     # arbitrary user code, stays in XLA

    out2d = residual_add(sublayer_x.reshape(B * S, D), x2d,
                         alias_x=alias_residual)
    return out2d.reshape(B, S, D), state


# --------------------------------------------------------------------------
# Pure-JAX reference
# --------------------------------------------------------------------------
def ref_forward(x, gamma, beta, sublayer_fn):
    mean = jnp.mean(x, axis=-1, keepdims=True)
    var = jnp.mean((x - mean) ** 2, axis=-1, keepdims=True)
    xn = (x - mean) / jnp.sqrt(var + _LN_EPS) * gamma + beta
    sub_x, state = sublayer_fn(xn)
    return sub_x + x, state


if __name__ == "__main__":
    B, S, D = 2, 8, 32
    key = jax.random.PRNGKey(0)
    kx, kw, kb = jax.random.split(key, 3)

    x = jax.random.normal(kx, (B, S, D), dtype=jnp.float32)

    # LayerNorm params (torch defaults are weight=1, bias=0); perturbed so the
    # affine path is exercised.
    ln_gamma = jnp.ones((D,), jnp.float32) + 0.01 * jnp.arange(D, dtype=jnp.float32)
    ln_beta = 0.001 * jnp.arange(D, dtype=jnp.float32)

    # Example wrapped sublayer: a linear projection.
    W = jax.random.normal(kw, (D, D), dtype=jnp.float32) * 0.05
    bias = jax.random.normal(kb, (D,), dtype=jnp.float32) * 0.05

    def sublayer_fn(xn):
        out = jnp.einsum("bsd,de->bse", xn, W,
                         precision=jax.lax.Precision.HIGHEST) + bias
        return out, jnp.mean(out)   # arbitrary auxiliary state, passed through

    # Generic path (Pallas LN + XLA sublayer + Pallas residual).
    out_gen, state_gen = sublayer_forward(x, ln_gamma, ln_beta, sublayer_fn)

    # Fused fast path (single pallas_call: LN -> matmul+bias -> residual).
    out_fused, _ = fused_linear_sublayer_forward(x, ln_gamma, ln_beta, W, bias)

    out_gen = jax.block_until_ready(out_gen)
    state_gen = jax.block_until_ready(state_gen)
    out_fused = jax.block_until_ready(out_fused)

    ref_out, ref_state = ref_forward(x, ln_gamma, ln_beta, sublayer_fn)

    assert jnp.allclose(out_gen, ref_out, atol=1e-4, rtol=1e-4), \
        "generic-path output mismatch"
    assert jnp.allclose(state_gen, ref_state, atol=1e-4, rtol=1e-4), \
        "generic-path state mismatch"
    # Fused path uses the MXU's f32 pass decomposition; slightly looser bound.
    assert jnp.allclose(out_fused, ref_out, atol=1e-3, rtol=1e-3), \
        "fused-path output mismatch"

    print("KERNEL_OK")
</pallas_src>

<mosaic_0001>
module attributes {stable_mosaic.version = 11 : i64} {
  func.func @_layernorm_kernel(%arg0: i32, %arg1: memref<16x32xf32, #tpu.memory_space<vmem>>, %arg2: memref<1x32xf32, #tpu.memory_space<vmem>>, %arg3: memref<1x32xf32, #tpu.memory_space<vmem>>, %arg4: memref<16x32xf32, #tpu.memory_space<vmem>>) attributes {dimension_semantics = [#tpu.dimension_semantics<parallel>], iteration_bounds = array<i64: 1>, scalar_prefetch = 0 : i64, scratch_operands = 0 : i64, tpu.core_type = #tpu.core_type<tc>, window_params = [{transform_indices = @transform_0, window_bounds = array<i64: 16, 32>}, {pipeline_mode = #tpu.pipeline_mode<synchronous>, transform_indices = @transform_1, window_bounds = array<i64: 1, 32>}, {pipeline_mode = #tpu.pipeline_mode<synchronous>, transform_indices = @transform_2, window_bounds = array<i64: 1, 32>}, {transform_indices = @transform_3, window_bounds = array<i64: 16, 32>}]} {
    %c0 = arith.constant 0 : index
    %c0_0 = arith.constant 0 : index
    %0 = vector.load %arg1[%c0, %c0_0] : memref<16x32xf32, #tpu.memory_space<vmem>>, vector<16x32xf32>
    %cst = arith.constant dense<0.000000e+00> : vector<16xf32>
    %1 = vector.multi_reduction <add>, %0, %cst [1] : vector<16x32xf32> to vector<16xf32>
    %2 = vector.shape_cast %1 : vector<16xf32> to vector<16x1xf32>
    %cst_1 = arith.constant 3.200000e+01 : f32
    %3 = vector.broadcast %cst_1 : f32 to vector<16x1xf32>
    %4 = arith.divf %2, %3 : vector<16x1xf32>
    %5 = vector.broadcast %4 : vector<16x1xf32> to vector<16x32xf32>
    %6 = arith.subf %0, %5 : vector<16x32xf32>
    %7 = arith.mulf %6, %6 : vector<16x32xf32>
    %cst_2 = arith.constant dense<0.000000e+00> : vector<16xf32>
    %8 = vector.multi_reduction <add>, %7, %cst_2 [1] : vector<16x32xf32> to vector<16xf32>
    %9 = vector.shape_cast %8 : vector<16xf32> to vector<16x1xf32>
    %cst_3 = arith.constant 3.200000e+01 : f32
    %10 = vector.broadcast %cst_3 : f32 to vector<16x1xf32>
    %11 = arith.divf %9, %10 : vector<16x1xf32>
    %cst_4 = arith.constant 9.99999974E-6 : f32
    %12 = vector.broadcast %cst_4 : f32 to vector<16x1xf32>
    %13 = arith.addf %11, %12 : vector<16x1xf32>
    %14 = math.rsqrt %13 : vector<16x1xf32>
    %15 = vector.broadcast %14 : vector<16x1xf32> to vector<16x32xf32>
    %16 = arith.mulf %6, %15 : vector<16x32xf32>
    %c0_5 = arith.constant 0 : index
    %c0_6 = arith.constant 0 : index
    %17 = vector.load %arg2[%c0_5, %c0_6] : memref<1x32xf32, #tpu.memory_space<vmem>>, vector<1x32xf32>
    %18 = vector.broadcast %17 : vector<1x32xf32> to vector<16x32xf32>
    %19 = arith.mulf %16, %18 : vector<16x32xf32>
    %c0_7 = arith.constant 0 : index
    %c0_8 = arith.constant 0 : index
    %20 = vector.load %arg3[%c0_7, %c0_8] : memref<1x32xf32, #tpu.memory_space<vmem>>, vector<1x32xf32>
    %21 = vector.broadcast %20 : vector<1x32xf32> to vector<16x32xf32>
    %22 = arith.addf %19, %21 : vector<16x32xf32>
    %c0_9 = arith.constant 0 : index
    %c0_10 = arith.constant 0 : index
    %23 = vector.load %arg4[%c0_9, %c0_10] : memref<16x32xf32, #tpu.memory_space<vmem>>, vector<16x32xf32>
    tpu.vector_store %arg4[%c0_9, %c0_10], %22 {strides = array<i32>} : memref<16x32xf32, #tpu.memory_space<vmem>>, vector<16x32xf32>,
    return
  }
  func.func @transform_0(%arg0: i32) -> (i32, i32) {
    %c0_i32 = arith.constant 0 : i32
    %c0_i32_0 = arith.constant 0 : i32
    return %arg0, %c0_i32 : i32, i32
  }
  func.func @transform_1(%arg0: i32) -> (i32, i32) {
    %c0_i32 = arith.constant 0 : i32
    %c0_i32_0 = arith.constant 0 : i32
    %c0_i32_1 = arith.constant 0 : i32
    return %c0_i32, %c0_i32_0 : i32, i32
  }
  func.func @transform_2(%arg0: i32) -> (i32, i32) {
    %c0_i32 = arith.constant 0 : i32
    %c0_i32_0 = arith.constant 0 : i32
    %c0_i32_1 = arith.constant 0 : i32
    return %c0_i32, %c0_i32_0 : i32, i32
  }
  func.func @transform_3(%arg0: i32) -> (i32, i32) {
    %c0_i32 = arith.constant 0 : i32
    %c0_i32_0 = arith.constant 0 : i32
    return %arg0, %c0_i32 : i32, i32
  }
}

</mosaic_0001>

<bundles_post_ra>
// kernel: tpu_custom_call.1
= control target key start
LH: loop header
LB: loop body
LE: loop exit
PB: predicated region body
PF: predicated region fallthrough
CT: control target
= control target key end

     0   :  { %8 = vsyncpa [#allocation3], 0  ;;  %s275_s0 = inlined_call_operand.hbm [shape: f32[16,32], index: 0, kind: input, shape index: {}]   ;;  %s276_s1 = inlined_call_operand.hbm [shape: f32[1,32], index: 1, kind: input, shape index: {}]   ;;  %s277_s2 = inlined_call_operand.vmem [shape: f32[1,32], index: 2, kind: input, shape index: {}]   ;;  %s278_s3 = inlined_call_operand.hbm [shape: f32[16,32], index: 3, kind: output, shape index: {}]  }
   0x1   :  { %9 = vsyncpa [#allocation6], 0 }
   0x2   :  { %10 = vsyncpa [#allocation4], 0  ;;  %s15_s14 = sshll.u32 %s275_s0, 4  ;;  %s225_s15 = smov [#allocation2]   ;;  %s16_s14 = int_to_ptr.hbm [resolvable:$true] %s15_s14 }
   0x3   :  { %s17_s16 = sshll.u32 %s225_s15, 4  ;;  %s29_s19 = sshll.u32 %s276_s1, 4  ;;  %s18_s16 = int_to_ptr.vmem [resolvable:$true] %s17_s16  ;;  %s30_s19 = int_to_ptr.hbm [resolvable:$true] %s29_s19 }
   0x4   :  { %s226_s20 = smov 128   ;;  %s227_s21 = smov 8  }
   0x5   :  { %23 = dma.hbm_to_vmem [thread:$0]  %s16_s14, 256, %s18_s16, [#allocation3], %s226_s20, %s226_s20, %s227_s21  }
   0x6   :  { %s228_s22 = smov [#allocation5]  }
   0x7   :  { %s31_s23 = sshll.u32 %s228_s22, 4  ;;  %s32_s23 = int_to_ptr.vmem [resolvable:$true] %s31_s23 }
   0x8   :  { %34 = dma.hbm_to_vmem [thread:$0]  %s30_s19, 16, %s32_s23, [#allocation6]  }
   0x9   :  { %219 = dma.done.wait [#allocation3], 256  }
   0xa   :  { %220 = vsyncadd [#allocation3], 4294967040 }
   0xb   :  { %221 = dma.done.wait [#allocation6], 16  }
   0xc   :  { %222 = vsyncadd [#allocation6], 4294967280  ;;  %vm47_vm0 = vcmask 261120   ;;  %v45_v0 = vld [vmem:[#allocation2] sm:$0xff]  ;;  %v46_v2 = vld [vmem:[#allocation2 + $0x8] sm:$0xff]  ;;  %v229_v4 = vmov 32.0  }
   0xd   :  { %v48_v1 = vsel %vm47_vm0, %v45_v0, 0.0  ;;  %v51_v3 = vsel %vm47_vm0, %v46_v2, 0.0  ;;  %141 = vrcp.f32 %v229_v4  ;;  %v139_v35 = vld [vmem:[#allocation5] ss:$0 sm:$0xff]  ;;  %v140_v39 = vld [vmem:[%s277_s2] ss:$0 sm:$0xff] }
   0xe   :  { %49 = vadd.xlane.f32.xlu0 %v48_v1  ;;  %s230_s24 = smov [#allocation7]   ;;  %s119_s28 = sshll.u32 %s278_s3, 4  ;;  %s120_s28 = int_to_ptr.hbm [resolvable:$true] %s119_s28 }
   0xf   :  { %s117_s25 = sshll.u32 %s230_s24, 4  ;;  %s118_s25 = int_to_ptr.vmem [resolvable:$true] %s117_s25 }
  0x13   :  { %v142_v5 = vpop.eup %141 }
  0x14   :  { %v55_v6 = vmul.f32 32.0, %v142_v5  ;;  %vm59_vm1 = vweird.f32 %v142_v5 }
  0x16   :  { %52 = vadd.xlane.f32.xlu0 %v51_v3  ;;  %v56_v7 = vsub.f32 1.0, %v55_v6 }
  0x18   :  { %v57_v8 = vmul.f32 %v142_v5, %v56_v7 }
  0x1a   :  { %v58_v9 = vadd.f32 %v142_v5, %v57_v8 }
  0x1c   :  { %v60_v10 = vsel %vm59_vm1, %v142_v5, %v58_v9 }
  0x81   :  { %v50_v11 = vpop.xlane.xlu0 %49 }
  0x82   :  { %v61_v12 = vmul.f32 %v60_v10, %v50_v11 }
  0x84   :  { %v63_v13 = vsub.f32 %v45_v0, %v61_v12 }
  0x86   :  { %v65_v14 = vmul.f32 %v63_v13, %v63_v13 }
  0x88   :  { %v67_v15 = vsel %vm47_vm0, %v65_v14, 0.0 }
  0x89   :  { %68 = vadd.xlane.f32.xlu1 %v67_v15  ;;  %v53_v16 = vpop.xlane.xlu0 %52 }
  0x8a   :  { %v62_v17 = vmul.f32 %v60_v10, %v53_v16 }
  0x8c   :  { %v64_v18 = vsub.f32 %v46_v2, %v62_v17 }
  0x8e   :  { %v66_v19 = vmul.f32 %v64_v18, %v64_v18 }
  0x90   :  { %v70_v20 = vsel %vm47_vm0, %v66_v19, 0.0 }
  0x91   :  { %71 = vadd.xlane.f32.xlu1 %v70_v20 }
  0xfc   :  { %v69_v21 = vpop.xlane.xlu1 %68 }
  0xfd   :  { %v73_v22 = vmul.f32 %v69_v21, %v60_v10 }
  0xff   :  { %v75_v23 = vadd.f32 1e-05, %v73_v22 }
 0x101   :  { %143 = vrsqrt.f32 %v75_v23  ;;  %vm83_vm3 = vweird.f32 %v75_v23 }
 0x104   :  { %v72_v24 = vpop.xlane.xlu1 %71 }
 0x105   :  { %v74_v25 = vmul.f32 %v72_v24, %v60_v10 }
 0x107   :  { %v144_v26 = vpop.eup %143  ;;  %v76_v27 = vadd.f32 1e-05, %v74_v25 }
 0x108   :  { %v78_v28 = vmul.f32 %v144_v26, %v75_v23  ;;  %vm84_vm2 = vweird.f32 %v144_v26 }
 0x109   :  { %145 = vrsqrt.f32 %v76_v27  ;;  %vm85_vm4 = vmor %vm83_vm3, %vm84_vm2  ;;  %vm93_vm6 = vweird.f32 %v76_v27 }
 0x10a   :  { %v79_v29 = vmul.f32 %v144_v26, %v78_v28 }
 0x10c   :  { %v80_v30 = vmul.f32 0.5, %v79_v29 }
 0x10e   :  { %v81_v31 = vsub.f32 1.5, %v80_v30 }
 0x10f   :  { %v146_v32 = vpop.eup %145 }
 0x110   :  { %v82_v33 = vmul.f32 %v144_v26, %v81_v31  ;;  %v88_v34 = vmul.f32 %v146_v32, %v76_v27  ;;  %vm94_vm5 = vweird.f32 %v146_v32 }
 0x111   :  { %vm95_vm7 = vmor %vm93_vm6, %vm94_vm5 }
 0x112   :  { %v86_v36 = vsel %vm85_vm4, %v144_v26, %v82_v33  ;;  %v89_v37 = vmul.f32 %v146_v32, %v88_v34 }
 0x113   :  { %v97_v38 = vmul.f32 %v86_v36, %v63_v13 }
 0x114   :  { %v90_v40 = vmul.f32 0.5, %v89_v37 }
 0x115   :  { %v103_v41 = vmul.f32 %v139_v35, %v97_v38 }
 0x116   :  { %v91_v42 = vsub.f32 1.5, %v90_v40 }
 0x117   :  { %v109_v43 = vadd.f32 %v140_v39, %v103_v41 }
 0x118   :  { %v92_v44 = vmul.f32 %v146_v32, %v91_v42 }
 0x119   :  { %111 = vst.msk [vmem:[#allocation7] sm:$0xff] %vm47_vm0, %v109_v43 }
 0x11a   :  { %v96_v45 = vsel %vm95_vm7, %v146_v32, %v92_v44 }
 0x11b   :  { %v98_v46 = vmul.f32 %v96_v45, %v64_v18 }
 0x11d   :  { %v104_v47 = vmul.f32 %v139_v35, %v98_v46 }
 0x11f   :  { %v110_v48 = vadd.f32 %v140_v39, %v104_v47 }
 0x121   :  { %112 = vst.msk [vmem:[#allocation7 + $0x8] sm:$0xff] %vm47_vm0, %v110_v48 }
 0x122   :  { %125 = dma.vmem_to_hbm [thread:$0]  %s118_s25, 256, %s120_s28, [#allocation4], %s226_s20, %s226_s20, %s227_s21  }
 0x123   :  { %223 = dma.done.wait [#allocation4], 256  }
 0x124   :  { %224 = vsyncadd [#allocation4], 4294967040 }
 0x125   :  { %130 = vsyncpa [#allocation3], 1 }
 0x126   :  { %131 = vsyncpa [#allocation6], 1 }
 0x127   :  { %132 = vsyncpa [#allocation4], 1 }

</bundles_post_ra>
